<compile_context>
chip_gen: v6e
topology: v6e:2x2x1
jax: 0.10.0
libtpu: 0.0.40
codegen_flags: <defaults>
</compile_context>

<pallas_src>
import jax
import jax.numpy as jnp
from jax.experimental import pallas as pl
from jax.experimental.pallas import tpu as pltpu
import numpy as np


# ----------------------------- kernel bodies ------------------------------ #

def _res_kernel_s1(x_ref, dw_w_ref, dw_b_ref, bpw_ref, bres_ref, pw_b_ref,
                   o_ref, hpad_ref):
    """stride=1.

    x_ref    : (H, W*Cin)        image, channels flattened into lanes
    dw_w_ref : (9, W*Cin)        depthwise 3x3 weights (row = kh*3+kw), tiled W times
    dw_b_ref : (1, W*Cin)        depthwise bias, tiled
    bpw_ref  : (W*Cin, W*Cout)   block-diagonal 1x1-conv weight
    bres_ref : (W*Cin, W*Cout)   block-diagonal channel-pad identity (residual)
    pw_b_ref : (1, W*Cout)       pointwise bias, tiled
    o_ref    : (H, W*Cout)       lane-dense output
    hpad_ref : (H+2, (W+2)*Cin)  VMEM scratch: zero-padded image
    """
    H, WC = x_ref.shape
    Cin = (hpad_ref.shape[1] - WC) // 2
    Ho, _ = o_ref.shape

    # Build the zero-padded image in VMEM (1-px border on every side).
    hpad_ref[...] = jnp.zeros_like(hpad_ref)
    hpad_ref[1:H + 1, Cin:Cin + WC] = x_ref[...]

    # 3x3 depthwise conv: 9 shifted fused multiply-adds over the scratch ref.
    acc = jnp.zeros((Ho, WC), jnp.float32) + dw_b_ref[...]
    for kh in range(3):
        for kw in range(3):
            t = kh * 3 + kw
            acc += (hpad_ref[kh:kh + Ho, kw * Cin:kw * Cin + WC]
                    * dw_w_ref[t:t + 1, :])

    # 1x1 pointwise conv (block-diag MXU matmul) + channel-padded residual + ReLU.
    y = jnp.dot(acc, bpw_ref[...], preferred_element_type=jnp.float32)
    y += jnp.dot(x_ref[...], bres_ref[...], preferred_element_type=jnp.float32)
    y += pw_b_ref[...]
    o_ref[...] = jnp.maximum(y, 0.0).astype(o_ref.dtype)


def _res_kernel_s2(p00_ref, p01_ref, p10_ref, p11_ref,
                   dw_w_ref, dw_b_ref, bpw_ref, bres_ref, pw_b_ref, o_ref):
    """stride=2.

    p{pq}_ref : (Ho+1, (Wo+1)*Cin)  the 4 spatial phases of the bottom/right
                zero-padded input — a stride-2 3x3 depthwise conv becomes 9
                unstrided shifted FMAs over these phases.
    The 2x2 max-pool residual is the elementwise max of the four phases over
    the top-left Ho x Wo region (which never touches the zero padding).
    """
    Ho, _ = o_ref.shape
    WoCin = bpw_ref.shape[0]
    Cin = p00_ref.shape[1] - WoCin
    ph = ((p00_ref, p01_ref), (p10_ref, p11_ref))

    acc = jnp.zeros((Ho, WoCin), jnp.float32) + dw_b_ref[...]
    for kh in range(3):
        for kw in range(3):
            src = ph[kh % 2][kw % 2]
            r0 = kh // 2
            c0 = (kw // 2) * Cin
            t = kh * 3 + kw
            acc += src[r0:r0 + Ho, c0:c0 + WoCin] * dw_w_ref[t:t + 1, :]

    # In-kernel 2x2 max-pool residual (free VPU maxes over resident phases).
    res = jnp.maximum(
        jnp.maximum(p00_ref[0:Ho, 0:WoCin], p01_ref[0:Ho, 0:WoCin]),
        jnp.maximum(p10_ref[0:Ho, 0:WoCin], p11_ref[0:Ho, 0:WoCin]))

    y = jnp.dot(acc, bpw_ref[...], preferred_element_type=jnp.float32)
    y += jnp.dot(res, bres_ref[...], preferred_element_type=jnp.float32)
    y += pw_b_ref[...]
    o_ref[...] = jnp.maximum(y, 0.0).astype(o_ref.dtype)


# ------------------------------- wrapper ----------------------------------- #

def res_module_pallas(x, params, out_channels, stride=1):
    """x: (N, Cin, H, W) float32, PyTorch NCHW. Returns (N, Cout, Ho, Wo)."""
    N, Cin, H, W = x.shape
    Cout = out_channels
    x_nhwc = jnp.transpose(x, (0, 2, 3, 1)).astype(jnp.float32)

    if stride == 1:
        Ho, Wo = H, W
    else:
        Ho, Wo = H // 2, W // 2   # module semantics assume even H, W for stride=2

    # ---- parameters in the lane-flattened layout -------------------------- #
    w9 = jnp.transpose(params["dw_w"][:, 0], (1, 2, 0)).reshape(9, Cin)   # (9, Cin)
    dw_wt = jnp.tile(w9, (1, Wo)).astype(jnp.float32)                     # (9, Wo*Cin)
    dw_bt = jnp.tile(params["dw_b"].reshape(1, Cin), (1, Wo)).astype(jnp.float32)
    pw_mat = params["pw_w"][:, :, 0, 0].T.astype(jnp.float32)             # (Cin, Cout)
    eye_w = jnp.eye(Wo, dtype=jnp.float32)
    bpw = jnp.kron(eye_w, pw_mat)                                         # (Wo*Cin, Wo*Cout)
    bres = jnp.kron(eye_w, jnp.eye(Cin, Cout, dtype=jnp.float32))         # channel-pad residual
    pw_bt = jnp.tile(params["pw_b"].reshape(1, Cout), (1, Wo)).astype(jnp.float32)

    def img_spec(arr):        # per-image 2-D slab, batch dim squeezed out
        return pl.BlockSpec((None,) + arr.shape[1:], lambda n: (n, 0, 0))

    def full_spec(arr):       # small parameter matrices, same block for every image
        return pl.BlockSpec(arr.shape, lambda n: (0, 0))

    param_inputs = (dw_wt, dw_bt, bpw, bres, pw_bt)
    param_specs = [full_spec(a) for a in param_inputs]

    if stride == 1:
        x2 = x_nhwc.reshape(N, H, W * Cin)        # free row-major reshape
        kernel = _res_kernel_s1
        inputs = (x2,) + param_inputs
        in_specs = [img_spec(x2)] + param_specs
        scratch_shapes = [pltpu.VMEM((H + 2, (W + 2) * Cin), jnp.float32)]
    else:
        # F.pad(x, (0,2,0,2)): zero-pad bottom/right of H,W by 2; split the 4
        # spatial phases so the stride-2 conv is unstrided inside the kernel.
        h_pad = jnp.pad(x_nhwc, ((0, 0), (0, 2), (0, 2), (0, 0)))
        phases = tuple(
            h_pad[:, p::2, q::2, :].reshape(N, Ho + 1, (Wo + 1) * Cin)
            for p in (0, 1) for q in (0, 1))
        kernel = _res_kernel_s2
        inputs = phases + param_inputs
        in_specs = [img_spec(p) for p in phases] + param_specs
        scratch_shapes = []

    out2 = pl.pallas_call(
        kernel,
        out_shape=jax.ShapeDtypeStruct((N, Ho, Wo * Cout), jnp.float32),
        grid=(N,),
        in_specs=in_specs,
        out_specs=pl.BlockSpec((None, Ho, Wo * Cout), lambda n: (n, 0, 0)),
        scratch_shapes=scratch_shapes,
        compiler_params=pltpu.CompilerParams(
            dimension_semantics=("parallel",),
            vmem_limit_bytes=32 * 1024 * 1024),
    )(*inputs)

    out_nhwc = out2.reshape(N, Ho, Wo, Cout)      # free row-major reshape
    return jnp.transpose(out_nhwc, (0, 3, 1, 2))  # back to NCHW


# --------------------------- plain-JAX reference --------------------------- #

def res_module_ref(x, params, out_channels, stride=1):
    N, Cin, H, W = x.shape
    Cout = out_channels
    if stride == 2:
        h = jnp.pad(x, ((0, 0), (0, 0), (0, 2), (0, 2)))
        pad = "VALID"
        xr = jax.lax.reduce_window(x, -jnp.inf, jax.lax.max,
                                   (1, 1, 2, 2), (1, 1, 2, 2), "VALID")
    else:
        h = x
        pad = ((1, 1), (1, 1))
        xr = x
    dw = jax.lax.conv_general_dilated(
        h, params["dw_w"], (stride, stride), pad,
        feature_group_count=Cin,
        dimension_numbers=("NCHW", "OIHW", "NCHW"))
    dw = dw + params["dw_b"][None, :, None, None]
    pw = jax.lax.conv_general_dilated(
        dw, params["pw_w"], (1, 1), "VALID",
        dimension_numbers=("NCHW", "OIHW", "NCHW"))
    pw = pw + params["pw_b"][None, :, None, None]
    if Cout > Cin:
        xr = jnp.pad(xr, ((0, 0), (0, Cout - Cin), (0, 0), (0, 0)))
    return jnp.maximum(pw + xr, 0.0)


# ---------------------------------- main ----------------------------------- #

def make_params(key, in_channels, out_channels):
    k1, k2, k3, k4 = jax.random.split(key, 4)
    return {
        "dw_w": 0.2 * jax.random.normal(k1, (in_channels, 1, 3, 3), jnp.float32),
        "dw_b": 0.1 * jax.random.normal(k2, (in_channels,), jnp.float32),
        "pw_w": 0.2 * jax.random.normal(k3, (out_channels, in_channels, 1, 1), jnp.float32),
        "pw_b": 0.1 * jax.random.normal(k4, (out_channels,), jnp.float32),
    }


if __name__ == "__main__":
    key = jax.random.PRNGKey(0)
    kx, kp = jax.random.split(key)
    N, Cin, Cout, H, W = 2, 4, 8, 16, 16
    x = jax.random.normal(kx, (N, Cin, H, W), jnp.float32)
    params = make_params(kp, Cin, Cout)

    ok = True
    for stride in (1, 2):
        out = jax.block_until_ready(res_module_pallas(x, params, Cout, stride))
        ref = jax.block_until_ready(res_module_ref(x, params, Cout, stride))
        if not np.allclose(np.asarray(out), np.asarray(ref), atol=1e-5, rtol=1e-5):
            ok = False
            print(f"mismatch at stride={stride}: "
                  f"max abs err {np.max(np.abs(np.asarray(out) - np.asarray(ref)))}")
    if ok:
        print("KERNEL_OK")
</pallas_src>

<mosaic_0001>
module attributes {stable_mosaic.version = 11 : i64} {
  func.func @_res_kernel_s1(%arg0: i32, %arg1: memref<1x16x64xf32, #tpu.memory_space<vmem>>, %arg2: memref<9x64xf32, #tpu.memory_space<vmem>>, %arg3: memref<1x64xf32, #tpu.memory_space<vmem>>, %arg4: memref<64x128xf32, #tpu.memory_space<vmem>>, %arg5: memref<64x128xf32, #tpu.memory_space<vmem>>, %arg6: memref<1x128xf32, #tpu.memory_space<vmem>>, %arg7: memref<1x16x128xf32, #tpu.memory_space<vmem>>, %arg8: memref<18x72xf32, #tpu.memory_space<vmem>>) attributes {dimension_semantics = [#tpu.dimension_semantics<parallel>], iteration_bounds = array<i64: 2>, scalar_prefetch = 0 : i64, scratch_operands = 1 : i64, tpu.core_type = #tpu.core_type<tc>, window_params = [{transform_indices = @transform_0, window_bounds = array<i64: 1, 16, 64>}, {pipeline_mode = #tpu.pipeline_mode<synchronous>, transform_indices = @transform_1, window_bounds = array<i64: 9, 64>}, {pipeline_mode = #tpu.pipeline_mode<synchronous>, transform_indices = @transform_2, window_bounds = array<i64: 1, 64>}, {pipeline_mode = #tpu.pipeline_mode<synchronous>, transform_indices = @transform_3, window_bounds = array<i64: 64, 128>}, {pipeline_mode = #tpu.pipeline_mode<synchronous>, transform_indices = @transform_4, window_bounds = array<i64: 64, 128>}, {pipeline_mode = #tpu.pipeline_mode<synchronous>, transform_indices = @transform_5, window_bounds = array<i64: 1, 128>}, {transform_indices = @transform_6, window_bounds = array<i64: 1, 16, 128>}]} {
    %cst = arith.constant 0.000000e+00 : f32
    %0 = vector.broadcast %cst : f32 to vector<18x72xf32>
    %c0 = arith.constant 0 : index
    %c0_0 = arith.constant 0 : index
    %1 = vector.load %arg8[%c0, %c0_0] : memref<18x72xf32, #tpu.memory_space<vmem>>, vector<18x72xf32>
    tpu.vector_store %arg8[%c0, %c0_0], %0 {strides = array<i32>} : memref<18x72xf32, #tpu.memory_space<vmem>>, vector<18x72xf32>,
    %c0_1 = arith.constant 0 : index
    %c0_2 = arith.constant 0 : index
    %c0_3 = arith.constant 0 : index
    %2 = vector.load %arg1[%c0_1, %c0_2, %c0_3] : memref<1x16x64xf32, #tpu.memory_space<vmem>>, vector<1x16x64xf32>
    %3 = vector.shape_cast %2 : vector<1x16x64xf32> to vector<16x64xf32>
    %c1 = arith.constant 1 : index
    %c4 = arith.constant 4 : index
    %4 = vector.load %arg8[%c1, %c4] : memref<18x72xf32, #tpu.memory_space<vmem>>, vector<16x64xf32>
    tpu.vector_store %arg8[%c1, %c4], %3 {strides = array<i32>} : memref<18x72xf32, #tpu.memory_space<vmem>>, vector<16x64xf32>,
    %cst_4 = arith.constant 0.000000e+00 : f32
    %5 = vector.broadcast %cst_4 : f32 to vector<16x64xf32>
    %c0_5 = arith.constant 0 : index
    %c0_6 = arith.constant 0 : index
    %6 = vector.load %arg3[%c0_5, %c0_6] : memref<1x64xf32, #tpu.memory_space<vmem>>, vector<1x64xf32>
    %7 = vector.broadcast %6 : vector<1x64xf32> to vector<16x64xf32>
    %8 = arith.addf %5, %7 : vector<16x64xf32>
    %c0_7 = arith.constant 0 : index
    %c0_8 = arith.constant 0 : index
    %9 = vector.load %arg8[%c0_7, %c0_8] : memref<18x72xf32, #tpu.memory_space<vmem>>, vector<16x64xf32>
    %c0_9 = arith.constant 0 : index
    %c0_10 = arith.constant 0 : index
    %10 = vector.load %arg2[%c0_9, %c0_10] : memref<9x64xf32, #tpu.memory_space<vmem>>, vector<1x64xf32>
    %11 = vector.broadcast %10 : vector<1x64xf32> to vector<16x64xf32>
    %12 = arith.mulf %9, %11 : vector<16x64xf32>
    %13 = arith.addf %8, %12 : vector<16x64xf32>
    %c0_11 = arith.constant 0 : index
    %c4_12 = arith.constant 4 : index
    %14 = vector.load %arg8[%c0_11, %c4_12] : memref<18x72xf32, #tpu.memory_space<vmem>>, vector<16x64xf32>
    %c1_13 = arith.constant 1 : index
    %c0_14 = arith.constant 0 : index
    %15 = vector.load %arg2[%c1_13, %c0_14] : memref<9x64xf32, #tpu.memory_space<vmem>>, vector<1x64xf32>
    %16 = vector.broadcast %15 : vector<1x64xf32> to vector<16x64xf32>
    %17 = arith.mulf %14, %16 : vector<16x64xf32>
    %18 = arith.addf %13, %17 : vector<16x64xf32>
    %c0_15 = arith.constant 0 : index
    %c8 = arith.constant 8 : index
    %19 = vector.load %arg8[%c0_15, %c8] : memref<18x72xf32, #tpu.memory_space<vmem>>, vector<16x64xf32>
    %c2 = arith.constant 2 : index
    %c0_16 = arith.constant 0 : index
    %20 = vector.load %arg2[%c2, %c0_16] : memref<9x64xf32, #tpu.memory_space<vmem>>, vector<1x64xf32>
    %21 = vector.broadcast %20 : vector<1x64xf32> to vector<16x64xf32>
    %22 = arith.mulf %19, %21 : vector<16x64xf32>
    %23 = arith.addf %18, %22 : vector<16x64xf32>
    %c1_17 = arith.constant 1 : index
    %c0_18 = arith.constant 0 : index
    %24 = vector.load %arg8[%c1_17, %c0_18] : memref<18x72xf32, #tpu.memory_space<vmem>>, vector<16x64xf32>
    %c3 = arith.constant 3 : index
    %c0_19 = arith.constant 0 : index
    %25 = vector.load %arg2[%c3, %c0_19] : memref<9x64xf32, #tpu.memory_space<vmem>>, vector<1x64xf32>
    %26 = vector.broadcast %25 : vector<1x64xf32> to vector<16x64xf32>
    %27 = arith.mulf %24, %26 : vector<16x64xf32>
    %28 = arith.addf %23, %27 : vector<16x64xf32>
    %c1_20 = arith.constant 1 : index
    %c4_21 = arith.constant 4 : index
    %29 = vector.load %arg8[%c1_20, %c4_21] : memref<18x72xf32, #tpu.memory_space<vmem>>, vector<16x64xf32>
    %c4_22 = arith.constant 4 : index
    %c0_23 = arith.constant 0 : index
    %30 = vector.load %arg2[%c4_22, %c0_23] : memref<9x64xf32, #tpu.memory_space<vmem>>, vector<1x64xf32>
    %31 = vector.broadcast %30 : vector<1x64xf32> to vector<16x64xf32>
    %32 = arith.mulf %29, %31 : vector<16x64xf32>
    %33 = arith.addf %28, %32 : vector<16x64xf32>
    %c1_24 = arith.constant 1 : index
    %c8_25 = arith.constant 8 : index
    %34 = vector.load %arg8[%c1_24, %c8_25] : memref<18x72xf32, #tpu.memory_space<vmem>>, vector<16x64xf32>
    %c5 = arith.constant 5 : index
    %c0_26 = arith.constant 0 : index
    %35 = vector.load %arg2[%c5, %c0_26] : memref<9x64xf32, #tpu.memory_space<vmem>>, vector<1x64xf32>
    %36 = vector.broadcast %35 : vector<1x64xf32> to vector<16x64xf32>
    %37 = arith.mulf %34, %36 : vector<16x64xf32>
    %38 = arith.addf %33, %37 : vector<16x64xf32>
    %c2_27 = arith.constant 2 : index
    %c0_28 = arith.constant 0 : index
    %39 = vector.load %arg8[%c2_27, %c0_28] : memref<18x72xf32, #tpu.memory_space<vmem>>, vector<16x64xf32>
    %c6 = arith.constant 6 : index
    %c0_29 = arith.constant 0 : index
    %40 = vector.load %arg2[%c6, %c0_29] : memref<9x64xf32, #tpu.memory_space<vmem>>, vector<1x64xf32>
    %41 = vector.broadcast %40 : vector<1x64xf32> to vector<16x64xf32>
    %42 = arith.mulf %39, %41 : vector<16x64xf32>
    %43 = arith.addf %38, %42 : vector<16x64xf32>
    %c2_30 = arith.constant 2 : index
    %c4_31 = arith.constant 4 : index
    %44 = vector.load %arg8[%c2_30, %c4_31] : memref<18x72xf32, #tpu.memory_space<vmem>>, vector<16x64xf32>
    %c7 = arith.constant 7 : index
    %c0_32 = arith.constant 0 : index
    %45 = vector.load %arg2[%c7, %c0_32] : memref<9x64xf32, #tpu.memory_space<vmem>>, vector<1x64xf32>
    %46 = vector.broadcast %45 : vector<1x64xf32> to vector<16x64xf32>
    %47 = arith.mulf %44, %46 : vector<16x64xf32>
    %48 = arith.addf %43, %47 : vector<16x64xf32>
    %c2_33 = arith.constant 2 : index
    %c8_34 = arith.constant 8 : index
    %49 = vector.load %arg8[%c2_33, %c8_34] : memref<18x72xf32, #tpu.memory_space<vmem>>, vector<16x64xf32>
    %c8_35 = arith.constant 8 : index
    %c0_36 = arith.constant 0 : index
    %50 = vector.load %arg2[%c8_35, %c0_36] : memref<9x64xf32, #tpu.memory_space<vmem>>, vector<1x64xf32>
    %51 = vector.broadcast %50 : vector<1x64xf32> to vector<16x64xf32>
    %52 = arith.mulf %49, %51 : vector<16x64xf32>
    %53 = arith.addf %48, %52 : vector<16x64xf32>
    %c0_37 = arith.constant 0 : index
    %c0_38 = arith.constant 0 : index
    %54 = vector.load %arg4[%c0_37, %c0_38] : memref<64x128xf32, #tpu.memory_space<vmem>>, vector<64x128xf32>
    %cst_39 = arith.constant dense<0.000000e+00> : vector<16x128xf32>
    %55 = tpu.matmul %53, %54, %cst_39 {dimension_numbers = #tpu.dot_dimension_numbers<[1], [0], [0], [1], [0, 0, 1, 1], [], []>} : vector<16x64xf32>, vector<64x128xf32>, vector<16x128xf32> -> vector<16x128xf32>
    %c0_40 = arith.constant 0 : index
    %c0_41 = arith.constant 0 : index
    %c0_42 = arith.constant 0 : index
    %56 = vector.load %arg1[%c0_40, %c0_41, %c0_42] : memref<1x16x64xf32, #tpu.memory_space<vmem>>, vector<1x16x64xf32>
    %57 = vector.shape_cast %56 : vector<1x16x64xf32> to vector<16x64xf32>
    %c0_43 = arith.constant 0 : index
    %c0_44 = arith.constant 0 : index
    %58 = vector.load %arg5[%c0_43, %c0_44] : memref<64x128xf32, #tpu.memory_space<vmem>>, vector<64x128xf32>
    %cst_45 = arith.constant dense<0.000000e+00> : vector<16x128xf32>
    %59 = tpu.matmul %57, %58, %cst_45 {dimension_numbers = #tpu.dot_dimension_numbers<[1], [0], [0], [1], [0, 0, 1, 1], [], []>} : vector<16x64xf32>, vector<64x128xf32>, vector<16x128xf32> -> vector<16x128xf32>
    %60 = arith.addf %55, %59 : vector<16x128xf32>
    %c0_46 = arith.constant 0 : index
    %c0_47 = arith.constant 0 : index
    %61 = vector.load %arg6[%c0_46, %c0_47] : memref<1x128xf32, #tpu.memory_space<vmem>>, vector<1x128xf32>
    %62 = vector.broadcast %61 : vector<1x128xf32> to vector<16x128xf32>
    %63 = arith.addf %60, %62 : vector<16x128xf32>
    %cst_48 = arith.constant 0.000000e+00 : f32
    %64 = vector.broadcast %cst_48 : f32 to vector<16x128xf32>
    %65 = arith.maximumf %63, %64 : vector<16x128xf32>
    %c0_49 = arith.constant 0 : index
    %c0_50 = arith.constant 0 : index
    %c0_51 = arith.constant 0 : index
    %66 = vector.load %arg7[%c0_49, %c0_50, %c0_51] : memref<1x16x128xf32, #tpu.memory_space<vmem>>, vector<1x16x128xf32>
    %67 = vector.shape_cast %66 : vector<1x16x128xf32> to vector<16x128xf32>
    %68 = vector.shape_cast %65 : vector<16x128xf32> to vector<1x16x128xf32>
    tpu.vector_store %arg7[%c0_49, %c0_50, %c0_51], %68 {strides = array<i32>} : memref<1x16x128xf32, #tpu.memory_space<vmem>>, vector<1x16x128xf32>,
    return
  }
  func.func @transform_0(%arg0: i32) -> (i32, i32, i32) {
    %c0_i32 = arith.constant 0 : i32
    %c0_i32_0 = arith.constant 0 : i32
    %c0_i32_1 = arith.constant 0 : i32
    return %arg0, %c0_i32, %c0_i32_0 : i32, i32, i32
  }
  func.func @transform_1(%arg0: i32) -> (i32, i32) {
    %c0_i32 = arith.constant 0 : i32
    %c0_i32_0 = arith.constant 0 : i32
    %c0_i32_1 = arith.constant 0 : i32
    return %c0_i32, %c0_i32_0 : i32, i32
  }
  func.func @transform_2(%arg0: i32) -> (i32, i32) {
    %c0_i32 = arith.constant 0 : i32
    %c0_i32_0 = arith.constant 0 : i32
    %c0_i32_1 = arith.constant 0 : i32
    return %c0_i32, %c0_i32_0 : i32, i32
  }
  func.func @transform_3(%arg0: i32) -> (i32, i32) {
    %c0_i32 = arith.constant 0 : i32
    %c0_i32_0 = arith.constant 0 : i32
    %c0_i32_1 = arith.constant 0 : i32
    return %c0_i32, %c0_i32_0 : i32, i32
  }
  func.func @transform_4(%arg0: i32) -> (i32, i32) {
    %c0_i32 = arith.constant 0 : i32
    %c0_i32_0 = arith.constant 0 : i32
    %c0_i32_1 = arith.constant 0 : i32
    return %c0_i32, %c0_i32_0 : i32, i32
  }
  func.func @transform_5(%arg0: i32) -> (i32, i32) {
    %c0_i32 = arith.constant 0 : i32
    %c0_i32_0 = arith.constant 0 : i32
    %c0_i32_1 = arith.constant 0 : i32
    return %c0_i32, %c0_i32_0 : i32, i32
  }
  func.func @transform_6(%arg0: i32) -> (i32, i32, i32) {
    %c0_i32 = arith.constant 0 : i32
    %c0_i32_0 = arith.constant 0 : i32
    %c0_i32_1 = arith.constant 0 : i32
    return %arg0, %c0_i32, %c0_i32_0 : i32, i32, i32
  }
}

</mosaic_0001>

<bundles_post_ra>
// kernel: tpu_custom_call.1
= control target key start
LH: loop header
LB: loop body
LE: loop exit
PB: predicated region body
PF: predicated region fallthrough
CT: control target
= control target key end

     0   :  { %11 = vsyncpa [#allocation4], 0  ;;  %s1487_s0 = inlined_call_operand.hbm [shape: f32[2,16,64], index: 0, kind: input, shape index: {}]   ;;  %s1488_s1 = inlined_call_operand.hbm [shape: f32[9,64], index: 1, kind: input, shape index: {}]   ;;  %s1489_s2 = inlined_call_operand.vmem [shape: f32[1,64], index: 2, kind: input, shape index: {}]   ;;  %s1490_s3 = inlined_call_operand.hbm [shape: f32[64,128], index: 3, kind: input, shape index: {}]   ;;  %s1491_s4 = inlined_call_operand.hbm [shape: f32[64,128], index: 4, kind: input, shape index: {}]   ;;  %s1492_s5 = inlined_call_operand.vmem [shape: f32[1,128], index: 5, kind: input, shape index: {}]   ;;  %s1493_s6 = inlined_call_operand.hbm [shape: f32[2,16,128], index: 6, kind: output, shape index: {}]  }
   0x1   :  { %13 = vsyncpa [#allocation4 + $0x1], 0 }
   0x2   :  { %14 = vsyncpa [#allocation7], 0 }
   0x3   :  { %15 = vsyncpa [#allocation10], 0 }
   0x4   :  { %16 = vsyncpa [#allocation5], 0 }
   0x5   :  { %18 = vsyncpa [#allocation5 + $0x1], 0  ;;  %s1217_s21 = smov 0   ;;  %s1219_s22 = smov 0  }
   0x6   :  { %s1221_s23 = smov 0   ;;  %s1223_s24 = smov 0  }
   0x7 LB: > { %s1238_s25 = sadd.s32 4294967295, %s1167_s24   ;;  %s809_s26 = sadd.s32 4294967294, %s1167_s24   ;;  %s1167_s24 = sphi %s1223_s24, %s1520_s24   ;;  %s1163_s23 = sphi %s1221_s23, %s1519_s23   ;;  %s1159_s22 = sphi %s1219_s22, %s1518_s22   ;;  %s1155_s21 = sphi %s1217_s21, %s1517_s21  }
   0x8   : > { %p44_p0 = scmp.ne.s32.totalorder %s1159_s22, %s1155_s21  ;;  %p1494_p1 = scmp.eq.s32.totalorder %s1238_s25, 0 }
   0x9   : > { %p173_p2 = scmp.eq.s32.totalorder %s1238_s25, 1  ;;  %p179_p3 = scmp.eq.s32.totalorder %s809_s26, 1 }
   0xa   : > { %p1247_p4 = por %p1494_p1, %p44_p0  ;;  %p810_p5 = scmp.ge.s32.totalorder %s1167_s24, 1 }
   0xb   : > { %p1252_p6 = por %p179_p3, %p44_p0  ;;  %p186_p7 = scmp.lt.s32.totalorder %s1167_s24, 3 }
   0xc   : > { %s1500_s27 = scalar_select %p1247_p4, 1, 0 }
   0xd   : > { %s1501_s28 = scalar_select %p1252_p6, 1, 0 }
   0xe   : > { %p1257_p8 = pnand %p810_p5, %p186_p7  ;;  %s1169_s30 = smov [#allocation6]  }
   0xf   : > { %s198_s7 = sshll.u32 %s1169_s30, 4  ;;  %s1170_s9 = smov [#allocation8]   ;;  %s199_s7 = int_to_ptr.vmem [resolvable:$true] %s198_s7 }
  0x10   : > { %s1502_s29 = scalar_select %p1257_p8, 1, 0 }
  0x11   : > { %p920_p9 = pneg %p1257_p8  ;;  %s214_s10 = sshll.u32 %s1170_s9, 4  ;;  %s215_s10 = int_to_ptr.vmem [resolvable:$true] %s214_s10 }
  0x12   : > { %s1171_s11 = smov [#allocation9]   ;;  %s1000_s13 = scalar_lea.vmem %s199_s7, 256 }
  0x13   : > { %p1266_p11 = pnand %p920_p9, %p1494_p1  ;;  %s227_s12 = sshll.u32 %s1171_s11, 4  ;;  %s228_s12 = int_to_ptr.vmem [resolvable:$true] %s227_s12 }
  0x14   : > { %p1001_p13 = scmp.ne.s32.totalorder %s199_s7, %s1000_s13  ;;  %p1008_p5 = scmp.lt.s32.totalorder %s199_s7, %s199_s7 }
  0x15   : > { %p991_p12 = pneg %p1266_p11  ;;  %p1009_p7 = scmp.lt.s32.totalorder %s1000_s13, %s1000_s13 }
  0x17   : > { %p1003_p0 = pnand %p1001_p13, %p991_p12  ;;  %p1010_p9 = por %p1009_p7, %p1008_p5 }
  0x19   : > { %p1004_p3 = pneg %p1003_p0 }
  0x1b   : > { %p1011_p10 = pnand %p1010_p9, %p1004_p3 }
  0x1d   : > { %1014 = shalt.err (!%p1011_p10)
}
  0x1e   : > { %s1495_s14 = smov 128   ;;  %s1496_s15 = smov 8  }
  0x1f   : > { %923 = dma.hbm_to_vmem [thread:$0]  (!%p1266_p11), %s1488_s1, 256, %s199_s7, [#allocation7], %s1495_s14, %s1495_s14, %s1496_s15  }
  0x20   : > { %s1026_s18 = scalar_lea.vmem %s215_s10, 1024  ;;  %p1034_p3 = scmp.lt.s32.totalorder %s215_s10, %s215_s10 }
  0x21   : > { %p1027_p13 = scmp.ne.s32.totalorder %s215_s10, %s1026_s18  ;;  %p1035_p10 = scmp.lt.s32.totalorder %s1026_s18, %s1026_s18 }
  0x23   : > { %p1029_p0 = pnand %p1027_p13, %p991_p12  ;;  %p1036_p7 = por %p1035_p10, %p1034_p3 }
  0x25   : > { %p1030_p5 = pneg %p1029_p0 }
  0x27   : > { %p1037_p9 = pnand %p1036_p7, %p1030_p5 }
  0x29   : > { %1040 = shalt.err (!%p1037_p9)
}
  0x2a   : > { %926 = dma.hbm_to_vmem [thread:$0]  (!%p1266_p11), %s1490_s3, 1024, %s215_s10, [#allocation7], %s1495_s14, %s1495_s14, %s1496_s15  }
  0x2b   : > { %s1052_s26 = scalar_lea.vmem %s228_s12, 1024  ;;  %p1060_p3 = scmp.lt.s32.totalorder %s228_s12, %s228_s12 }
  0x2c   : > { %p1053_p1 = scmp.ne.s32.totalorder %s228_s12, %s1052_s26  ;;  %p1061_p5 = scmp.lt.s32.totalorder %s1052_s26, %s1052_s26 }
  0x2e   : > { %p1055_p13 = pnand %p1053_p1, %p991_p12  ;;  %p1062_p10 = por %p1061_p5, %p1060_p3 }
  0x30   : > { %p1056_p0 = pneg %p1055_p13 }
  0x32   : > { %p1063_p7 = pnand %p1062_p10, %p1056_p0 }
  0x34   : > { %1066 = shalt.err (!%p1063_p7)
}
  0x35   : > { %929 = dma.hbm_to_vmem [thread:$0]  (!%p1266_p11), %s1491_s4, 1024, %s228_s12, [#allocation10], %s1495_s14, %s1495_s14, %s1496_s15  }
  0x36   : > { %s1306_s9 = sadd.s32 1, %s1167_s24   ;;  %s31_s10 = sadd.s32 1, %s1163_s23 }
  0x37   : > { %s28_s8 = ssub.s32 %s1167_s24, %s1306_s9  ;;  %p38_p12 = scmp.ne.s32.totalorder %s1163_s23, %s1159_s22 }
  0x38   : > { %p29_p1 = scmp.eq.s32.totalorder %s28_s8, 0  ;;  %p39_p9 = scmp.eq.s32.totalorder %s1167_s24, 0 }
  0x39   : > { %p941_p13 = scmp.lt.s32.totalorder %s1167_s24, 2  ;;  %p1320_p3 = por %p173_p2, %p38_p12 }
  0x3a   : > { %s1316_s11 = scalar_select %p29_p1, %s1163_s23, %s31_s10  }
  0x3b   : > { %p40_p0 = por %p39_p9, %p38_p12  ;;  %s244_s16 = sand.u32 1, %s1163_s23  }
  0x3c   : > { %s1504_s13 = scalar_select %p1320_p3, 1, 0 }
  0x3d   : > { %s844_s17 = sshll.u32 %s1167_s24, 8  ;;  %s815_s12 = sshll.u32 %s244_s16, 4 }
  0x3e   : > { %s1329_s20 = scalar_lea.hbm %s1487_s0, %s844_s17  ;;  %s248_s26 = scalar_lea.vmem [#allocation3], %s815_s12 }
  0x3f   : > { %s255_s30 = sshll.u32 %s248_s26, 4  ;;  %p1331_p11 = pnand %p941_p13, %p40_p0  ;;  %s1335_s30 = int_to_ptr.vmem [resolvable:$true] %s255_s30 }
  0x40   : > { %s1337_s8 = scalar_lea.sflag [#allocation4], %s244_s16  ;;  %s1067_s10 = scalar_lea.hbm %s1329_s20, 256 }
  0x41   : > { %p1068_p2 = scmp.ne.s32.totalorder %s1329_s20, %s1067_s10  ;;  %p1069_p5 = pneg %p1331_p11 }
  0x42   : > { %s1072_s12 = scalar_lea.hbm %s1487_s0, 512  ;;  %p1073_p1 = scmp.lt.s32.totalorder %s1329_s20, %s1487_s0 }
  0x43   : > { %p1070_p10 = pnand %p1069_p5, %p1068_p2  ;;  %p1074_p12 = scmp.lt.s32.totalorder %s1072_s12, %s1067_s10 }
  0x45   : > { %p1071_p7 = pneg %p1070_p10  ;;  %p1075_p9 = por %p1074_p12, %p1073_p1 }
  0x47   : > { %p1076_p13 = pnand %p1075_p9, %p1071_p7 }
  0x49   : > { %1079 = shalt.err (!%p1076_p13)
}
  0x4a   : > { %s1080_s16 = scalar_lea.vmem %s1335_s30, 256  ;;  %s1174_s14 = smov [#allocation3]  }
  0x4b   : > { %p1081_p0 = scmp.ne.s32.totalorder %s1335_s30, %s1080_s16  ;;  %s1085_s15 = sshll.u32 %s1174_s14, 4  ;;  %s1086_s15 = int_to_ptr.vmem [resolvable:$false] %s1085_s15 }
  0x4c   : > { %s1087_s17 = scalar_lea.vmem %s1086_s15, 512  ;;  %p1088_p10 = scmp.lt.s32.totalorder %s1335_s30, %s1086_s15 }
  0x4d   : > { %p1083_p6 = pnand %p1081_p0, %p1069_p5  ;;  %p1089_p3 = scmp.lt.s32.totalorder %s1087_s17, %s1080_s16 }
  0x4f   : > { %p1084_p2 = pneg %p1083_p6  ;;  %p1090_p4 = por %p1089_p3, %p1088_p10 }
  0x51   : > { %p1091_p8 = pnand %p1090_p4, %p1084_p2 }
  0x53   : > { %1094 = shalt.err (!%p1091_p8)
}
  0x54   : > { %s1506_s10 = smov 8   ;;  %s1507_s18 = smov 128  }
  0x55   : > { %933 = dma.hbm_to_vmem [thread:$0]  (!%p1331_p11), %s1329_s20, 256, %s1335_s30, %s1337_s8, %s1507_s18, %s1507_s18, %s1506_s10  }
  0x56   : > { %p1508_p6 = scmp.ne.s32.totalorder %s1502_s29, 0 }
  0x57   : > { %s1364_s14 = sand.u32 (!%p1508_p6), 1, %s1159_s22   ;;  %p1509_p4 = scmp.ne.s32.totalorder (!%p1508_p6), %s1500_s27, 0 }
  0x58   : > { %267 = sbr.rel (%p1508_p6) target bundleno = 584 (0x248), region = 44  ;;  %s819_s15 = sshll.u32 (!%p1508_p6), %s1364_s14, 4 }
  0x59   : > { %s270_s12 = scalar_lea.sflag (!%p1508_p6), [#allocation4], %s1364_s14  ;;  %s273_s7 = scalar_lea.vmem (!%p1508_p6), [#allocation3], %s819_s15 }
  0x5d   : > { %1138 = dma.done.wait (%p1509_p4), %s270_s12, 256  }
  0x5e   : > { %1140 = vsyncadd (%p1509_p4), %s270_s12, 4294967040  ;;  %p1510_p8 = scmp.eq.s32.totalorder %s1238_s25, 0 }
  0x60   : > { %1142 = dma.done.wait (%p1510_p8), [#allocation7], 1280   ;;  %p1511_p3 = pmov %p1510_p8 }
  0x62   : > { %1144 = vsyncadd (%p1511_p3), [#allocation7], 4294966016  ;;  %p1512_p11 = pmov %p1511_p3 }
  0x63   : > { %p1513_p5 = pmov %p1511_p3 }
  0x64   : > { %1146 = dma.done.wait (%p1512_p11), [#allocation10], 1024  }
  0x65   : > { %1148 = vsyncadd (%p1513_p5), [#allocation10], 4294966272  ;;  %vm314_vm0 = vcmask 588800   ;;  %v1175_v0 = vmov 0.0   ;;  %vm317_vm1 = vcmask 582656   ;;  %v1382_v2 = vld [vmem:[%s273_s7] sm:$0xff] }
  0x66   : > { %315 = vst.msk [vmem:[#allocation2] sm:$0xff] %vm314_vm0, %v1175_v0  ;;  %316 = vst.msk [vmem:[#allocation2 + $0x8] sm:$0xff] %vm314_vm0, %v1175_v0  ;;  %v826_v1 = vld [vmem:[#allocation6 + $0x1] ss:$0 sm:$0xff]  ;;  %s1176_s27 = smov 4   ;;  %v1385_v4 = vld [vmem:[%s273_s7 + $0x8] sm:$0xff] }
  0x67   : > { %318 = vst.msk [vmem:[#allocation2 + $0x10] sm:$0x3] %vm317_vm1, %v1175_v0  ;;  %357 = vrot.lane.b32.xlu1 %v826_v1, %s1176_s27  ;;  %323 = vrot.lane.b32.xlu0 %v1382_v2, %s1176_s27  ;;  %v827_v3 = vld [vmem:[#allocation6 + $0x2] ss:$0 sm:$0xff]  ;;  %s1177_s29 = smov 8   ;;  %vm329_vm2 = vcmask 556064  }
  0x68   : > { %v830_v5 = vld [vmem:[#allocation6 + $0x5] ss:$0 sm:$0xff]  ;;  %v829_v6 = vld [vmem:[#allocation6 + $0x4] ss:$0 sm:$0xff]  ;;  %v833_v7 = vld [vmem:[#allocation6 + $0x8] ss:$0 sm:$0xff] }
  0x69   : > { %v832_v8 = vld [vmem:[#allocation6 + $0x7] ss:$0 sm:$0xff]  ;;  %v516_v12 = vld [vmem:[#allocation9 + $0x38] sm:$0xff]  ;;  %s1178_s20 = smov 124   ;;  %v514_v17 = vld [vmem:[#allocation9 + $0x28] sm:$0xff]  ;;  %s1179_s30 = smov 120  }
  0x6a   : > { %v515_v13 = vld [vmem:[#allocation9 + $0x30] sm:$0xff]  ;;  %v506_v14 = vld [vmem:[#allocation8 + $0x38] sm:$0xff]  ;;  %866 = vmatprep.subr.mxu0 %v516_v12  ;;  %v513_v20 = vld [vmem:[#allocation9 + $0x20] sm:$0xff]  ;;  %vm517_vm3 = vcmask 523264   ;;  %s313_s17 = scalar_lea.vmem [#allocation11], %s819_s15  ;;  %s845_s18 = sshll.u32 %s1238_s25, 8 }
  0x6b   : > { %378 = vrot.lane.b32.xlu1 %v827_v3, %s1177_s29  ;;  %325 = vrot.lane.b32.xlu0 %v1385_v4, %s1176_s27  ;;  %v505_v18 = vld [vmem:[#allocation8 + $0x30] sm:$0xff]  ;;  %v504_v23 = vld [vmem:[#allocation8 + $0x28] sm:$0xff]  ;;  %v512_v27 = vld [vmem:[#allocation9 + $0x18] sm:$0xff]  ;;  %s707_s10 = sshll.u32 %s313_s17, 4  ;;  %p1514_p1 = scmp.ne.s32.totalorder %s1504_s13, 0  ;;  %s1438_s10 = int_to_ptr.vmem [resolvable:$true] %s707_s10 }
  0x6c   : > { %885 = vmatprep.subr.mxu1 %v506_v14  ;;  %867 = vmatpush3.msra.mxu0 %v516_v12  ;;  %v503_v28 = vld [vmem:[#allocation8 + $0x20] sm:$0xff]  ;;  %v511_v32 = vld [vmem:[#allocation9 + $0x10] sm:$0xff]  ;;  %v502_v33 = vld [vmem:[#allocation8 + $0x18] sm:$0xff]  ;;  %s1095_s15 = scalar_lea.vmem %s1438_s10, 256  ;;  %s1180_s25 = smov [#allocation11]  }
  0x6d   : > { %868 = vmatprep.subr.mxu0 %v515_v13  ;;  %886 = vmatpush3.msra.mxu1 %v506_v14  ;;  %v510_v35 = vld [vmem:[#allocation9 + $0x8] sm:$0xff]  ;;  %v501_v37 = vld [vmem:[#allocation8 + $0x10] sm:$0xff]  ;;  %v509_v41 = vld [vmem:[#allocation9] sm:$0xff]  ;;  %p1096_p7 = scmp.ne.s32.totalorder %s1438_s10, %s1095_s15 }
  0x6e   : > { %869 = vmatpush3.msra.mxu0 %v515_v13  ;;  %887 = vmatprep.subr.mxu1 %v505_v18  ;;  %v500_v42 = vld [vmem:[#allocation8 + $0x8] sm:$0xff]  ;;  %v499_v47 = vld [vmem:[#allocation8] sm:$0xff]  ;;  %v825_v51 = vld [vmem:[#allocation6] ss:$0 sm:$0xff] }
  0x6f   : > { %431 = vrot.lane.b32.xlu1 %v830_v5, %s1177_s29  ;;  %410 = vrot.lane.b32.xlu0 %v829_v6, %s1176_s27  ;;  %v824_v53 = vld [vmem:[%s1489_s2] ss:$0 sm:$0xff]  ;;  %v828_v57 = vld [vmem:[#allocation6 + $0x3] ss:$0 sm:$0xff]  ;;  %v831_v6 = vld [vmem:[#allocation6 + $0x6] ss:$0 sm:$0xff]  ;;  %p1097_p12 = pnand %p1096_p7, %p1514_p1 }
  0x70   : > { %870 = vmatprep.subr.mxu0 %v514_v17  ;;  %888 = vmatpush3.msra.mxu1 %v505_v18 }
  0x71   : > { %871 = vmatpush3.msra.mxu0 %v514_v17  ;;  %889 = vmatprep.subr.mxu1 %v504_v23  ;;  %p1098_p9 = pneg %p1097_p12 }
  0x72   : > { %872 = vmatprep.subr.mxu0 %v513_v20  ;;  %890 = vmatpush3.msra.mxu1 %v504_v23 }
  0x73   : > { %484 = vrot.lane.b32.xlu1 %v833_v7, %s1177_s29  ;;  %463 = vrot.lane.b32.xlu0 %v832_v8, %s1176_s27  ;;  %s1443_s27 = scalar_lea.hbm %s1493_s6, %s845_s18 }
  0x74   : > { %873 = vmatpush3.msra.mxu0 %v513_v20  ;;  %891 = vmatprep.subr.mxu1 %v503_v28 }
  0x75   : > { %874 = vmatprep.subr.mxu0 %v512_v27  ;;  %892 = vmatpush3.msra.mxu1 %v503_v28 }
  0x76   : > { %875 = vmatpush3.msra.mxu0 %v512_v27  ;;  %893 = vmatprep.subr.mxu1 %v502_v33 }
  0x77   : > { %876 = vmatprep.subr.mxu0 %v511_v32  ;;  %894 = vmatpush3.msra.mxu1 %v502_v33 }
  0x78   : > { %877 = vmatpush3.msra.mxu0 %v511_v32  ;;  %895 = vmatprep.subr.mxu1 %v501_v37 }
  0x79   : > { %878 = vmatprep.subr.mxu0 %v510_v35  ;;  %896 = vmatpush3.msra.mxu1 %v501_v37 }
  0x7a   : > { %879 = vmatpush3.msra.mxu0 %v510_v35  ;;  %897 = vmatprep.subr.mxu1 %v500_v42 }
  0x7b   : > { %880 = vmatprep.subr.mxu0 %v509_v41  ;;  %882 = vmatprep.mubr.msk.f32.mxu0 %vm517_vm3, %v1382_v2 }
  0x7c   : > { %881 = vmatpush3.msra.mxu0 %v509_v41  ;;  %898 = vmatpush3.msra.mxu1 %v500_v42 }
  0x7d   : > { %883 = vmatmul.mubr.msk.f32.vlgmr.msra.gmra.mxu0 %vm517_vm3, %v1385_v4  ;;  %899 = vmatprep.subr.mxu1 %v499_v47 }
  0x7e   : > { %900 = vmatpush3.msra.mxu1 %v499_v47 }
  0xd9   : > { %v324_v9 = vpop.permute.xlu0 %323  ;;  %v358_v11 = vpop.permute.xlu1 %357 }
  0xda   : > { %330 = vst.msk [vmem:[#allocation2 + $0x1] sm:$0xff] %vm329_vm2, %v324_v9 }
  0xdd   : > { %v326_v10 = vpop.permute.xlu0 %325  ;;  %v379_v19 = vpop.permute.xlu1 %378 }
  0xde   : > { %331 = vst.msk [vmem:[#allocation2 + $0x9] sm:$0xff] %vm329_vm2, %v326_v10 }
  0xe1   : > { %v1391_v15 = vld [vmem:[#allocation2] sm:$0xff]  ;;  %v411_v25 = vpop.permute.xlu0 %410  ;;  %v432_v30 = vpop.permute.xlu1 %431 }
  0xe2   : > { %v360_v16 = vmul.f32 %v358_v11, %v1391_v15  ;;  %v381_v21 = vmul.f32 %v379_v19, %v1391_v15  ;;  %v1398_v24 = vld [vmem:[#allocation2 + $0x1] sm:$0xff]  ;;  %v347_v52 = vmul.f32 %v825_v51, %v1391_v15 }
  0xe3   : > { %v413_v29 = vmul.f32 %v411_v25, %v1398_v24  ;;  %v434_v36 = vmul.f32 %v432_v30, %v1398_v24  ;;  %v400_v62 = vmul.f32 %v828_v57, %v1398_v24 }
  0xe4   : > { %364 = vrot.lane.b32.xlu0 %v360_v16, %s1178_s20  ;;  %v349_v55 = vadd.f32 %v824_v53, %v347_v52 }
  0xe5   : > { %v1396_v22 = vld [vmem:[#allocation2 + $0x8] sm:$0xff]  ;;  %v464_v40 = vpop.permute.xlu0 %463  ;;  %v485_v45 = vpop.permute.xlu1 %484 }
  0xe6   : > { %v361_v26 = vmul.f32 %v358_v11, %v1396_v22  ;;  %v382_v31 = vmul.f32 %v379_v19, %v1396_v22  ;;  %v1405_v34 = vld [vmem:[#allocation2 + $0x9] sm:$0xff]  ;;  %v348_v56 = vmul.f32 %v825_v51, %v1396_v22 }
  0xe7   : > { %v414_v38 = vmul.f32 %v411_v25, %v1405_v34  ;;  %v446_v39 = vld [vmem:[#allocation2 + $0x2] sm:$0xff]  ;;  %v435_v44 = vmul.f32 %v432_v30, %v1405_v34  ;;  %v447_v46 = vld [vmem:[#allocation2 + $0xa] sm:$0xff]  ;;  %v401_v5 = vmul.f32 %v828_v57, %v1405_v34 }
  0xe8   : > { %385 = vrot.lane.b32.xlu0 %v381_v21, %s1179_s30  ;;  %366 = vrot.lane.b32.xlu1 %v361_v26, %s1178_s20  ;;  %v466_v43 = vmul.f32 %v464_v40, %v446_v39  ;;  %v487_v48 = vmul.f32 %v485_v45, %v446_v39  ;;  %v467_v49 = vmul.f32 %v464_v40, %v447_v46 }
  0xe9   : > { %v488_v50 = vmul.f32 %v485_v45, %v447_v46  ;;  %v350_v63 = vadd.f32 %v824_v53, %v348_v56  ;;  %v453_v12 = vmul.f32 %v831_v6, %v446_v39  ;;  %v454_v18 = vmul.f32 %v831_v6, %v447_v46 }
  0xec   : > { %417 = vrot.lane.b32.xlu0 %v413_v29, %s1178_s20  ;;  %387 = vrot.lane.b32.xlu1 %v382_v31, %s1179_s30  ;;  %v838_v29 = vld [vmem:[%s1492_s5] ss:$0 sm:$0xff] }
  0xf0   : > { %438 = vrot.lane.b32.xlu0 %v434_v36, %s1179_s30  ;;  %419 = vrot.lane.b32.xlu1 %v414_v38, %s1178_s20 }
  0xf4   : > { %470 = vrot.lane.b32.xlu0 %v466_v43, %s1178_s20  ;;  %440 = vrot.lane.b32.xlu1 %v435_v44, %s1179_s30 }
  0xf8   : > { %491 = vrot.lane.b32.xlu0 %v487_v48, %s1179_s30  ;;  %472 = vrot.lane.b32.xlu1 %v467_v49, %s1178_s20  ;;  %s694_s20 = scalar_lea.sflag [#allocation5], %s1364_s14 }
  0xfc   : > { %493 = vrot.lane.b32.xlu1 %v488_v50, %s1179_s30  ;;  %s1099_s30 = sshll.u32 %s1180_s25, 4  ;;  %s1100_s30 = int_to_ptr.vmem [resolvable:$false] %s1099_s30 }
  0xfd   : > { %s1101_s8 = scalar_lea.vmem %s1100_s30, 512  ;;  %p1102_p13 = scmp.lt.s32.totalorder %s1438_s10, %s1100_s30 }
  0xfe   : > { %p1103_p0 = scmp.lt.s32.totalorder %s1101_s8, %s1095_s15 }
 0x100   : > { %p1104_p2 = por %p1103_p0, %p1102_p13 }
 0x102   : > { %p1105_p10 = pnand %p1104_p2, %p1098_p9 }
 0x13d   : > { %v884_v27 = vpop.f32.mrf.mxu0 }
 0x13f   : > { %v590_v31 = vpop.f32.mrf.mxu0 }
 0x156   : > { %v365_v54 = vpop.permute.xlu0 %364 }
 0x157   : > { %v370_v58 = vadd.f32 %v365_v54, %v349_v55 }
 0x15a   : > { %v386_v59 = vpop.permute.xlu0 %385  ;;  %v367_v60 = vpop.permute.xlu1 %366 }
 0x15b   : > { %v391_v61 = vadd.f32 %v386_v59, %v370_v58  ;;  %v371_v1 = vadd.f32 %v367_v60, %v350_v63 }
 0x15d   : > { %v402_v0 = vadd.f32 %v400_v62, %v391_v61 }
 0x15e   : > { %v418_v2 = vpop.permute.xlu0 %417  ;;  %v388_v3 = vpop.permute.xlu1 %387 }
 0x15f   : > { %v392_v4 = vadd.f32 %v388_v3, %v371_v1  ;;  %v423_v7 = vadd.f32 %v418_v2, %v402_v0 }
 0x161   : > { %v403_v8 = vadd.f32 %v401_v5, %v392_v4 }
 0x162   : > { %v439_v9 = vpop.permute.xlu0 %438  ;;  %v420_v10 = vpop.permute.xlu1 %419 }
 0x163   : > { %v444_v11 = vadd.f32 %v439_v9, %v423_v7  ;;  %v424_v14 = vadd.f32 %v420_v10, %v403_v8 }
 0x165   : > { %v455_v13 = vadd.f32 %v453_v12, %v444_v11 }
 0x166   : > { %v471_v15 = vpop.permute.xlu0 %470  ;;  %v441_v16 = vpop.permute.xlu1 %440 }
 0x167   : > { %v445_v17 = vadd.f32 %v441_v16, %v424_v14  ;;  %v476_v19 = vadd.f32 %v471_v15, %v455_v13 }
 0x169   : > { %v456_v20 = vadd.f32 %v454_v18, %v445_v17 }
 0x16a   : > { %v492_v21 = vpop.permute.xlu0 %491  ;;  %v473_v22 = vpop.permute.xlu1 %472 }
 0x16b   : > { %v497_v23 = vadd.f32 %v492_v21, %v476_v19  ;;  %v477_v24 = vadd.f32 %v473_v22, %v456_v20 }
 0x16d   : > { %901 = vmatprep.mubr.msk.f32.mxu1 %vm517_vm3, %v497_v23 }
 0x16e   : > { %v494_v25 = vpop.permute.xlu1 %493 }
 0x16f   : > { %v498_v26 = vadd.f32 %v494_v25, %v477_v24 }
 0x171   : > { %902 = vmatmul.mubr.msk.f32.vlgmr.msra.gmra.mxu1 %vm517_vm3, %v498_v26 }
 0x231   : > { %v903_v28 = vpop.f32.mrf.mxu1 }
 0x232   : > { %v677_v30 = vadd.f32 %v903_v28, %v884_v27 }
 0x233   : > { %v671_v32 = vpop.f32.mrf.mxu1 }
 0x234   : > { %v688_v33 = vadd.f32 %v838_v29, %v677_v30  ;;  %v672_v34 = vadd.f32 %v671_v32, %v590_v31 }
 0x236   : > { %v690_v35 = vmax.f32 %v688_v33, 0.0  ;;  %v687_v36 = vadd.f32 %v838_v29, %v672_v34 }
 0x238   : > { %692 = vst [vmem:[%s313_s17 + $0x8] sm:$0xff] %v690_v35  ;;  %v689_v37 = vmax.f32 %v687_v36, 0.0 }
 0x23a   : > { %691 = vst [vmem:[%s313_s17] sm:$0xff] %v689_v37 }
 0x23b   : > { %1108 = shalt.err (!%p1105_p10)
}
 0x23c   : > { %s1109_s19 = scalar_lea.hbm %s1443_s27, 256  ;;  %s1113_s17 = scalar_lea.hbm %s1493_s6, 512 }
 0x23d   : > { %p1110_p6 = scmp.ne.s32.totalorder %s1443_s27, %s1109_s19  ;;  %p1114_p3 = scmp.lt.s32.totalorder %s1443_s27, %s1493_s6 }
 0x23e   : > { %p1115_p11 = scmp.lt.s32.totalorder %s1113_s17, %s1109_s19 }
 0x23f   : > { %p1111_p4 = pnand %p1110_p6, %p1514_p1 }
 0x240   : > { %p1116_p5 = por %p1115_p11, %p1114_p3 }
 0x241   : > { %p1112_p8 = pneg %p1111_p4 }
 0x243   : > { %p1117_p7 = pnand %p1116_p5, %p1112_p8 }
 0x245   : > { %1120 = shalt.err (!%p1117_p7)
}
 0x246   : > { %s1181_s7 = smov 128  }
 0x247   : > { %918 = dma.vmem_to_hbm [thread:$0]  (%p1514_p1), %s1438_s10, 256, %s1443_s27, %s694_s20, %s1181_s7, %s1181_s7, %s1177_s29  }
 0x248 PF: > { %s722_s15 = sand.u32 1, %s1155_s21   ;;  %p1515_p12 = scmp.ne.s32.totalorder %s1501_s28, 0 }
 0x249   : > { %p1516_p9 = scmp.ge.s32.totalorder %s1167_s24, 2  ;;  %s723_s25 = scalar_lea.sflag [#allocation5], %s722_s15 }
 0x24b   : > { %p935_p13 = pnand %p1516_p9, %p1515_p12 }
 0x24d   : > { %p936_p0 = pneg %p935_p13 }
 0x24f   : > { %1150 = dma.done.wait (%p936_p0), %s723_s25, 256  }
 0x250   : > { %1152 = vsyncadd (%p936_p0), %s723_s25, 4294967040  ;;  %p21_p2 = scmp.ge.s32.totalorder %s1306_s9, 4   ;;  %s1517_s21 = smov %s1159_s22 }
 0x251   : > { %s1518_s22 = smov %s1163_s23  ;;  %s1519_s23 = smov %s1316_s11 }
 0x252   : > { %s1520_s24 = smov %s1306_s9  ;;  %23 = sbr.rel (!%p21_p2) target bundleno = 7 (0x7), region = 101 }
 0x257   :  { %728 = vsyncpa [#allocation4], 1 }
 0x258   :  { %730 = vsyncpa [#allocation4 + $0x1], 1 }
 0x259   :  { %731 = vsyncpa [#allocation7], 1 }
 0x25a   :  { %732 = vsyncpa [#allocation10], 1 }
 0x25b   :  { %733 = vsyncpa [#allocation5], 1 }
 0x25c   :  { %735 = vsyncpa [#allocation5 + $0x1], 1 }

</bundles_post_ra>
